<compile_context>
chip_gen: v6e
topology: v6e:2x2x1
jax: 0.10.0
libtpu: 0.0.40
codegen_flags: <defaults>
</compile_context>

<pallas_src>
import jax
import jax.numpy as jnp
from jax.experimental import pallas as pl
from jax.experimental.pallas import tpu as pltpu


def _fused_kernel(params_ref, x_ref, noise_ref, out_ref):
    # params_ref: (C+1, O)  rows 0..C-1 = W^T, row C = bias
    # x_ref:      (tm, C)   already-permuted rows (one row per (b, s))
    # noise_ref:  (tm, O)   positional view of randn_like(x1)
    # out_ref:    (tm, O)
    x = x_ref[...]
    wt = params_ref[...]
    C = x.shape[1]
    O = out_ref.shape[1]

    # v2[m, o] = sum_c x[m, c] * W[o, c] + b[o]
    # K = C = 2, N = O = 2: VPU broadcast-FMAs, skip the MXU entirely.
    acc = x[:, 0:1] * wt[0:1, :]
    for c in range(1, C):                      # static unroll (C == 2)
        acc = acc + x[:, c:c + 1] * wt[c:c + 1, :]
    v2 = acc + wt[C:C + 1, :]                  # + bias row

    # x2 = relu(v2)
    x2 = jnp.maximum(v2, 0.0)

    # v4 = argmax(x2, dim=-1) with first-max tie-break (torch semantics).
    if O == 2:
        # One elementwise compare -- no XLU reductions, no iota.
        idx = (x2[:, 1:2] > x2[:, 0:1]).astype(x2.dtype)          # (tm, 1)
    else:
        # Generic fallback (first maximal index).
        iota = jax.lax.broadcasted_iota(jnp.int32, x2.shape, 1)
        maxv = jnp.max(x2, axis=1, keepdims=True)
        idx = jnp.min(jnp.where(x2 == maxv, iota, jnp.int32(O)),
                      axis=1, keepdims=True).astype(x2.dtype)     # (tm, 1)

    # v3 = x2 + idx ; v4 = (v3 == -1) ; out = v4 * noise
    v3 = x2 + idx
    v4 = (v3 == jnp.float32(-1.0)).astype(x2.dtype)
    # NOTE: v4 is mathematically all-zeros (relu >= 0, idx >= 0 => v3 >= 0),
    # so this store is a zero-fill; the full dataflow is kept for fidelity
    # with the reference module rather than short-circuiting to zeros.
    out_ref[...] = v4 * noise_ref[...]


def model_forward(x, weight, bias, noise, *, row_tile=512):
    """x: (B, C, S) float32, weight: (O, C), bias: (O,), noise: (B, C, S) = randn_like(x)."""
    B, C, S = x.shape
    O = weight.shape[0]
    M = B * S

    # Wrapper-side layout plumbing (cheap XLA ops, outside the kernel):
    #  * present x already permuted+flattened so the kernel is a plain row contraction,
    #  * fold W^T and bias into one (C+1, O) slab -> single parameter DMA,
    #  * view noise positionally as (M, O); the module's v4 * v5 broadcast is
    #    elementwise here because the (B, S, O) and (B, C, S) shapes coincide.
    # TODO(synk): the original module's v4 * v5 broadcast is only well-defined when
    # those shapes are broadcast-compatible (here they are equal); generalizing it
    # would need an explicit broadcast rule.
    x2d = jnp.transpose(x, (0, 2, 1)).reshape(M, C)
    noise2d = noise.reshape(M, O)
    params = jnp.concatenate([weight.T, bias[None, :]], axis=0)   # (C+1, O)

    # Single full block at toy size; 8-aligned row tiles + parallel grid axis if M grows
    # (shards across the 2 TensorCores on v7x; harmless on v5e/v6e).
    tm = M if M <= row_tile else row_tile
    grid = (pl.cdiv(M, tm),)

    out2d = pl.pallas_call(
        _fused_kernel,
        out_shape=jax.ShapeDtypeStruct((M, O), jnp.float32),
        grid=grid,
        in_specs=[
            pl.BlockSpec((C + 1, O), lambda i: (0, 0)),   # params: resident across grid
            pl.BlockSpec((tm, C), lambda i: (i, 0)),      # x rows
            pl.BlockSpec((tm, O), lambda i: (i, 0)),      # noise rows
        ],
        out_specs=pl.BlockSpec((tm, O), lambda i: (i, 0)),
        compiler_params=pltpu.CompilerParams(
            dimension_semantics=("parallel",)),
    )(params, x2d, noise2d)

    return out2d.reshape(B, S, O)


if __name__ == "__main__":
    key = jax.random.PRNGKey(0)
    kx, kn, kw, kb = jax.random.split(key, 4)

    # nn.Linear(2, 2): in_features = C = 2, out_features = O = 2; x1 is (B, C, S).
    B, C, S = 2, 2, 2
    O = 2

    x1 = jax.random.normal(kx, (B, C, S), dtype=jnp.float32)
    noise = jax.random.normal(kn, (B, C, S), dtype=jnp.float32)   # v5 = randn_like(x1)

    # Deterministic parameter init (mimics torch.nn.Linear uniform init range).
    bound = 1.0 / jnp.sqrt(jnp.float32(C))
    weight = jax.random.uniform(kw, (O, C), jnp.float32, -bound, bound)
    bias = jax.random.uniform(kb, (O,), jnp.float32, -bound, bound)

    fwd = jax.jit(model_forward)
    out = fwd(x1, weight, bias, noise)
    jax.block_until_ready(out)

    # Pure-JAX reference of the same math.
    v1 = jnp.transpose(x1, (0, 2, 1))
    v2 = v1 @ weight.T + bias
    x2 = jnp.maximum(v2, 0.0)
    idx = jnp.argmax(x2, axis=-1)[..., None].astype(x2.dtype)
    v3 = x2 + idx
    ref = (v3 == -1.0).astype(x2.dtype) * noise
    assert out.shape == ref.shape, "shape mismatch vs reference"
    assert jnp.allclose(out, ref, atol=1e-6), "mismatch vs reference"

    print("KERNEL_OK")
</pallas_src>

<mosaic_0001>
module attributes {stable_mosaic.version = 11 : i64} {
  func.func @_fused_kernel(%arg0: i32, %arg1: memref<3x2xf32, #tpu.memory_space<vmem>>, %arg2: memref<4x2xf32, #tpu.memory_space<vmem>>, %arg3: memref<4x2xf32, #tpu.memory_space<vmem>>, %arg4: memref<4x2xf32, #tpu.memory_space<vmem>>) attributes {dimension_semantics = [#tpu.dimension_semantics<parallel>], iteration_bounds = array<i64: 1>, scalar_prefetch = 0 : i64, scratch_operands = 0 : i64, tpu.core_type = #tpu.core_type<tc>, window_params = [{pipeline_mode = #tpu.pipeline_mode<synchronous>, transform_indices = @transform_0, window_bounds = array<i64: 3, 2>}, {transform_indices = @transform_1, window_bounds = array<i64: 4, 2>}, {transform_indices = @transform_2, window_bounds = array<i64: 4, 2>}, {transform_indices = @transform_3, window_bounds = array<i64: 4, 2>}]} {
    %c0 = arith.constant 0 : index
    %c0_0 = arith.constant 0 : index
    %0 = vector.load %arg2[%c0, %c0_0] : memref<4x2xf32, #tpu.memory_space<vmem>>, vector<4x2xf32>
    %c0_1 = arith.constant 0 : index
    %c0_2 = arith.constant 0 : index
    %1 = vector.load %arg1[%c0_1, %c0_2] : memref<3x2xf32, #tpu.memory_space<vmem>>, vector<3x2xf32>
    %2 = vector.extract_strided_slice %0 {offsets = [0, 0], sizes = [4, 1], strides = [1, 1]} : vector<4x2xf32> to vector<4x1xf32>
    %3 = vector.extract_strided_slice %1 {offsets = [0, 0], sizes = [1, 2], strides = [1, 1]} : vector<3x2xf32> to vector<1x2xf32>
    %4 = vector.broadcast %2 : vector<4x1xf32> to vector<4x2xf32>
    %5 = vector.broadcast %3 : vector<1x2xf32> to vector<4x2xf32>
    %6 = arith.mulf %4, %5 : vector<4x2xf32>
    %7 = vector.extract_strided_slice %0 {offsets = [0, 1], sizes = [4, 1], strides = [1, 1]} : vector<4x2xf32> to vector<4x1xf32>
    %8 = vector.extract_strided_slice %1 {offsets = [1, 0], sizes = [1, 2], strides = [1, 1]} : vector<3x2xf32> to vector<1x2xf32>
    %9 = vector.broadcast %7 : vector<4x1xf32> to vector<4x2xf32>
    %10 = vector.broadcast %8 : vector<1x2xf32> to vector<4x2xf32>
    %11 = arith.mulf %9, %10 : vector<4x2xf32>
    %12 = arith.addf %6, %11 : vector<4x2xf32>
    %13 = vector.extract_strided_slice %1 {offsets = [2, 0], sizes = [1, 2], strides = [1, 1]} : vector<3x2xf32> to vector<1x2xf32>
    %14 = vector.broadcast %13 : vector<1x2xf32> to vector<4x2xf32>
    %15 = arith.addf %12, %14 : vector<4x2xf32>
    %cst = arith.constant 0.000000e+00 : f32
    %16 = vector.broadcast %cst : f32 to vector<4x2xf32>
    %17 = arith.maximumf %15, %16 : vector<4x2xf32>
    %18 = vector.extract_strided_slice %17 {offsets = [0, 1], sizes = [4, 1], strides = [1, 1]} : vector<4x2xf32> to vector<4x1xf32>
    %19 = vector.extract_strided_slice %17 {offsets = [0, 0], sizes = [4, 1], strides = [1, 1]} : vector<4x2xf32> to vector<4x1xf32>
    %20 = arith.cmpf ogt, %18, %19 : vector<4x1xf32>
    %21 = arith.extui %20 : vector<4x1xi1> to vector<4x1xi32>
    %22 = arith.sitofp %21 : vector<4x1xi32> to vector<4x1xf32>
    %23 = vector.broadcast %22 : vector<4x1xf32> to vector<4x2xf32>
    %24 = arith.addf %17, %23 : vector<4x2xf32>
    %cst_3 = arith.constant -1.000000e+00 : f32
    %25 = vector.broadcast %cst_3 : f32 to vector<4x2xf32>
    %26 = arith.cmpf oeq, %24, %25 : vector<4x2xf32>
    %27 = arith.extui %26 : vector<4x2xi1> to vector<4x2xi32>
    %28 = arith.sitofp %27 : vector<4x2xi32> to vector<4x2xf32>
    %c0_4 = arith.constant 0 : index
    %c0_5 = arith.constant 0 : index
    %29 = vector.load %arg3[%c0_4, %c0_5] : memref<4x2xf32, #tpu.memory_space<vmem>>, vector<4x2xf32>
    %30 = arith.mulf %28, %29 : vector<4x2xf32>
    %c0_6 = arith.constant 0 : index
    %c0_7 = arith.constant 0 : index
    %31 = vector.load %arg4[%c0_6, %c0_7] : memref<4x2xf32, #tpu.memory_space<vmem>>, vector<4x2xf32>
    tpu.vector_store %arg4[%c0_6, %c0_7], %30 {strides = array<i32>} : memref<4x2xf32, #tpu.memory_space<vmem>>, vector<4x2xf32>,
    return
  }
  func.func @transform_0(%arg0: i32) -> (i32, i32) {
    %c0_i32 = arith.constant 0 : i32
    %c0_i32_0 = arith.constant 0 : i32
    %c0_i32_1 = arith.constant 0 : i32
    return %c0_i32, %c0_i32_0 : i32, i32
  }
  func.func @transform_1(%arg0: i32) -> (i32, i32) {
    %c0_i32 = arith.constant 0 : i32
    %c0_i32_0 = arith.constant 0 : i32
    return %arg0, %c0_i32 : i32, i32
  }
  func.func @transform_2(%arg0: i32) -> (i32, i32) {
    %c0_i32 = arith.constant 0 : i32
    %c0_i32_0 = arith.constant 0 : i32
    return %arg0, %c0_i32 : i32, i32
  }
  func.func @transform_3(%arg0: i32) -> (i32, i32) {
    %c0_i32 = arith.constant 0 : i32
    %c0_i32_0 = arith.constant 0 : i32
    return %arg0, %c0_i32 : i32, i32
  }
}

</mosaic_0001>

<bundles_post_ra>
// kernel: model_forward.1
= control target key start
LH: loop header
LB: loop body
LE: loop exit
PB: predicated region body
PF: predicated region fallthrough
CT: control target
= control target key end

     0   :  { %v109_v1 = vmov 0   ;;  %v110_v2 = vmov 1   ;;  %s146_s0 = inlined_call_operand.vmem [shape: f32[3,2], index: 0, kind: input, shape index: {}]   ;;  %s147_s1 = inlined_call_operand.vmem [shape: f32[4,2], index: 1, kind: input, shape index: {}]   ;;  %s148_s2 = inlined_call_operand.vmem [shape: f32[4,2], index: 2, kind: input, shape index: {}]   ;;  %s149_s3 = inlined_call_operand.hbm [shape: f32[4,2], index: 3, kind: output, shape index: {}]  }
   0x1   :  { %v15_v0 = vld [vmem:[%s147_s1] sm:$0xf]  ;;  %84 = vset.pattern.permute.xlu0 %v109_v1  ;;  %86 = vset.pattern.permute.xlu1 %v110_v2 }
   0x2   :  { %8 = vsyncpa [#allocation3], 0  ;;  %19 = vperm.xlu0 %84, %v15_v0   ;;  %v22_v3 = vlaneseq  ;;  %v16_v7 = vld [vmem:[%s146_s0] sm:$0x7]  ;;  %s111_s1 = smov 1   ;;  %v112_v20 = vmov 0.0  }
   0x3   :  { %v59_v24 = vld [vmem:[%s148_s2] sm:$0xf]  ;;  %s113_s17 = smov [#allocation2]   ;;  %vm61_vm2 = vcmask 11264  }
   0x4   :  { %v23_v4 = vshrl.u32 %v22_v3, 7  ;;  %s69_s18 = sshll.u32 %s113_s17, 4  ;;  %s70_s18 = int_to_ptr.vmem [resolvable:$true] %s69_s18 }
   0x5   :  { %s87_s19 = scalar_lea.vmem %s70_s18, 64  ;;  %p92_p1 = scmp.lt.s32.totalorder %s70_s18, %s70_s18 }
   0x6   :  { %85 = vset.pattern.permute.xlu0 %v110_v2  ;;  %v24_v5 = vsub.s32 0, %v23_v4  ;;  %v33_v6 = vsub.s32 1, %v23_v4  ;;  %v39_v11 = vsub.s32 2, %v23_v4  ;;  %p88_p0 = scmp.ne.s32.totalorder %s70_s18, %s87_s19  ;;  %p93_p2 = scmp.lt.s32.totalorder %s87_s19, %s87_s19 }
   0x7   :  { %28 = vperm.xlu0 %85, %v15_v0  }
   0x8   :  { %v25_v9 = vrot.slane %v16_v7, %v24_v5  ;;  %v34_v10 = vrot.slane %v16_v7, %v33_v6  ;;  %v40_v15 = vrot.slane %v16_v7, %v39_v11  ;;  %p94_p3 = por %p93_p2, %p92_p1 }
   0xa   :  { %p95_p4 = pnand %p94_p3, %p88_p0 }
  0x7d   :  { %v20_v8 = vpop.permute.xlu0 %19 }
  0x7e   :  { %v26_v13 = vmul.f32 %v25_v9, %v20_v8 }
  0x82   :  { %v29_v12 = vpop.permute.xlu0 %28 }
  0x83   :  { %v35_v14 = vmul.f32 %v34_v10, %v29_v12 }
  0x85   :  { %v36_v16 = vadd.f32 %v35_v14, %v26_v13 }
  0x87   :  { %v41_v17 = vadd.f32 %v40_v15, %v36_v16 }
  0x89   :  { %v42_v18 = vmax.f32 %v41_v17, 0.0 }
  0x8b   :  { %44 = vrot.lane.b32.xlu1 %v42_v18, %s111_s1 }
  0xfd   :  { %v45_v19 = vpop.permute.xlu1 %44 }
  0xfe   :  { %vm47_vm0 = vcmp.gt.f32.partialorder %v42_v18, %v45_v19 }
  0xff   :  { %v77_v21 = vsel %vm47_vm0, 1.0, %v112_v20 }
 0x100   :  { %52 = vperm.xlu1 %86, %v77_v21  }
 0x17b   :  { %v53_v22 = vpop.permute.xlu1 %52 }
 0x17c   :  { %v55_v23 = vadd.f32 %v53_v22, %v42_v18 }
 0x17e   :  { %vm56_vm1 = vcmp.eq.f32.partialorder %v55_v23, -1.0 }
 0x17f   :  { %v78_v25 = vsel %vm56_vm1, 1.0, %v112_v20 }
 0x180   :  { %v60_v26 = vmul.f32 %v78_v25, %v59_v24 }
 0x182   :  { %62 = vst.msk [vmem:[#allocation2] sm:$0xf] %vm61_vm2, %v60_v26 }
 0x183   :  { %98 = shalt.err (!%p95_p4)
}
 0x184   :  { %72 = dma.vmem_to_hbm [thread:$0]  %s70_s18, 64, %s149_s3, [#allocation3]  }
 0x185   :  { %107 = dma.done.wait [#allocation3], 64  }
 0x186   :  { %108 = vsyncadd [#allocation3], 4294967232 }
 0x187   :  { %76 = vsyncpa [#allocation3], 1 }

</bundles_post_ra>
